<compile_context>
chip_gen: v6e
topology: v6e:2x2x1
jax: 0.10.0
libtpu: 0.0.40
codegen_flags: <defaults>
</compile_context>

<pallas_src>
import functools

import numpy as np

import jax
import jax.numpy as jnp
from jax.experimental import pallas as pl
from jax.experimental.pallas import tpu as pltpu


def _round_up(v, m):
    return (v + m - 1) // m * m


def _cnn_text_fused_kernel(x_ref, w_ref, b_ref, m_ref, o_ref, *, max_w, l_valid):
    # x_ref: (TB, L, H)          w_ref: (max_w, H, Cpad)
    # b_ref: (1, Cpad) f32       m_ref: (l_valid, Cpad) f32 additive time mask
    # o_ref: (TB, Cpad)
    TB, L, H = x_ref.shape
    Cpad = w_ref.shape[2]

    xv = x_ref[...]
    l_padded = l_valid + max_w - 1
    if l_padded > L:  # static: zero-pad the time axis VMEM-locally (no HBM pad copy)
        xv = jnp.concatenate(
            [xv, jnp.zeros((TB, l_padded - L, H), xv.dtype)], axis=1)

    # Shift-combine folded into the MXU: acc[b, t, :] = sum_i x[b, t+i, :] @ W_i.
    # Full-lane-width f32 accumulation; no lane-offset slicing of the result.
    acc = jnp.dot(xv[:, 0:l_valid, :].reshape(TB * l_valid, H), w_ref[0],
                  preferred_element_type=jnp.float32)
    for i in range(1, max_w):  # static, tiny trip count
        xi = xv[:, i:i + l_valid, :].reshape(TB * l_valid, H)
        acc = acc + jnp.dot(xi, w_ref[i], preferred_element_type=jnp.float32)

    # Mask invalid time positions (per width group) with a large negative additive
    # term, then max-pool over time.  Bias + ReLU hoisted after the pool (exact).
    acc = acc.reshape(TB, l_valid, Cpad) + m_ref[...]
    pooled = jnp.max(acc, axis=1)                                  # (TB, Cpad)
    o_ref[...] = jnp.maximum(pooled + b_ref[...], 0.0).astype(o_ref.dtype)


def _usable_vmem_bytes():
    """~75% of the reported per-core VMEM (96 MiB on v5e/v6e, 48 MiB on v7x)."""
    cap = 64 << 20  # conservative fallback (v7x physical)
    try:
        info = pltpu.get_tpu_info()
        cap_attr = getattr(info, "vmem_capacity_bytes", None)
        if cap_attr:
            cap = int(cap_attr)
    except Exception:
        pass
    return (cap * 3) // 4


def _pick_batch_tile(B, L, Lt, Lpad, H, Cpad, itemsize, budget_bytes):
    """Largest batch tile (multiple of 8 dividing B, or B itself) whose per-step
    working set fits the budget, preferring >= 2 grid programs (dual TC on v7x)."""

    def per_step(tb):
        x_in = 2 * tb * L * H * itemsize          # double-buffered input tile
        x_pad = tb * Lpad * H * itemsize          # in-kernel zero-padded copy
        x_sl = 2 * tb * Lt * H * itemsize         # shifted-slice temporaries (<=2 live)
        acc = 3 * tb * Lt * Cpad * 4              # f32 accumulator + dot/mask temps
        out = 2 * tb * Cpad * itemsize            # double-buffered output tile
        return x_in + x_pad + x_sl + acc + out

    cands = sorted({t for t in range(8, B + 1, 8) if B % t == 0}, reverse=True)
    if not cands:
        cands = [B]
    preferred = [t for t in cands if B // t >= 2] or cands
    for t in preferred:
        if per_step(t) <= budget_bytes:
            return t
    return cands[-1]


def cnn_text_layer(x, weights, biases, widths):
    """x: (B, L, H).  weights[k]: (widths[k], H, Co).  biases[k]: (1, Co) or (Co,)."""
    B, L, H = x.shape
    widths = list(widths)
    max_w = max(widths)
    if L < max_w:
        raise ValueError(f"sequence length {L} < largest conv width {max_w}")

    co = weights[0].shape[2]
    n_w = len(widths)
    out_cols = n_w * co
    Cpad = _round_up(out_cols, 128)        # lane-dense fused output width
    Lt = _round_up(L, 8)                   # pooled time length (>= every Lout_k)
    Lpad = Lt + max_w - 1                  # in-kernel padded time length
    isz = x.dtype.itemsize

    # Per-shift weight slabs: w_big[i, :, k*Co + c] = W_k[i, :, c] (0 when i >= w_k
    # and in the lane-padding columns).
    slabs = []
    for i in range(max_w):
        parts = []
        for w_arr, wdt in zip(weights, widths):
            parts.append(w_arr[i] if i < wdt else jnp.zeros((H, co), w_arr.dtype))
        slabs.append(jnp.concatenate(parts, axis=1))          # (H, out_cols)
    w_big = jnp.stack(slabs, axis=0)                          # (max_w, H, out_cols)
    w_big = jnp.pad(w_big, ((0, 0), (0, 0), (0, Cpad - out_cols))).astype(x.dtype)

    b_big = jnp.concatenate([jnp.reshape(b, (1, co)) for b in biases], axis=1)
    b_big = jnp.pad(b_big.astype(jnp.float32), ((0, 0), (0, Cpad - out_cols)))

    # Additive time mask: -1e30 at time positions that are not valid conv outputs
    # for a given width group; 0 elsewhere (lane-padded columns stay fully valid,
    # so they pool to 0 and survive bias/ReLU as 0).
    mask_np = np.zeros((Lt, Cpad), np.float32)
    col = 0
    for wdt in widths:
        mask_np[L - wdt + 1:, col:col + co] = -1e30
        col += co
    t_mask = jnp.asarray(mask_np)

    usable = _usable_vmem_bytes()
    fixed = 2 * (max_w * H * Cpad * isz + Cpad * 4 + Lt * Cpad * 4)   # constants (worst case x2)
    tb = _pick_batch_tile(B, L, Lt, Lpad, H, Cpad, isz, max(usable - fixed, 4 << 20))

    kern = functools.partial(_cnn_text_fused_kernel, max_w=max_w, l_valid=Lt)

    def build_call(single_buffer_consts, vmem_limit):
        def const_spec(shape):
            idx = lambda b, _s=shape: (0,) * len(_s)
            if single_buffer_consts:
                try:
                    return pl.BlockSpec(shape, idx, pipeline_mode=pl.Buffered(1))
                except TypeError:
                    pass
            return pl.BlockSpec(shape, idx)

        cp_kwargs = dict(dimension_semantics=("parallel",))
        if vmem_limit is not None:
            cp_kwargs["vmem_limit_bytes"] = int(vmem_limit)

        return pl.pallas_call(
            kern,
            out_shape=jax.ShapeDtypeStruct((B, Cpad), x.dtype),
            grid=(B // tb,),
            in_specs=[
                pl.BlockSpec((tb, L, H), lambda b: (b, 0, 0)),   # x: tiled on batch only
                const_spec((max_w, H, Cpad)),                    # stacked per-shift weights
                const_spec((1, Cpad)),                           # bias
                const_spec((Lt, Cpad)),                          # additive time mask
            ],
            out_specs=pl.BlockSpec((tb, Cpad), lambda b: (b, 0)),
            compiler_params=pltpu.CompilerParams(**cp_kwargs),
        )

    try:
        out = build_call(True, usable)(x, w_big, b_big, t_mask)
    except Exception:
        # Conservative fallback: default double-buffering + default scoped VMEM limit.
        out = build_call(False, None)(x, w_big, b_big, t_mask)

    return out[:, :out_cols]   # drop lane padding -> (B, Co * len(widths))


def cnn_text_layer_ref(x, weights, biases, widths):
    """Pure-JAX reference mirroring the PyTorch forward (NCHW conv semantics)."""
    B, L, H = x.shape
    outs = []
    for w_arr, b_arr, width in zip(weights, biases, widths):
        Co = w_arr.shape[2]
        Lout = L - width + 1
        acc = jnp.zeros((B, Lout, Co), jnp.float32)
        for i in range(width):
            acc = acc + jnp.einsum("blh,hc->blc", x[:, i:i + Lout, :], w_arr[i])
        acc = jnp.maximum(acc + jnp.reshape(b_arr, (1, 1, Co)), 0.0)
        outs.append(jnp.max(acc, axis=1))
    return jnp.concatenate(outs, axis=1)


if __name__ == "__main__":
    # Small, module-consistent shapes: batch=2, seq_len=16, n_in (embed dim)=32,
    # widths=[3,4,5], filters=8  ->  output (2, 24).
    B, L, H = 2, 16, 32
    widths = [3, 4, 5]
    filters = 8

    key = jax.random.PRNGKey(0)
    kx, *kws = jax.random.split(key, 1 + 2 * len(widths))

    x = jax.random.normal(kx, (B, L, H), dtype=jnp.float32)

    weights, biases = [], []
    for idx, w in enumerate(widths):
        kw, kb = kws[2 * idx], kws[2 * idx + 1]
        # PyTorch Conv2d weight shape is (Co, Ci=1, w, H); store as (w, H, Co).
        w_torch = jax.random.normal(kw, (filters, 1, w, H), dtype=jnp.float32) * 0.1
        weights.append(jnp.transpose(w_torch[:, 0, :, :], (1, 2, 0)))
        biases.append(
            (jax.random.normal(kb, (filters,), dtype=jnp.float32) * 0.1).reshape(1, filters))

    out = jax.block_until_ready(cnn_text_layer(x, weights, biases, widths))
    ref = cnn_text_layer_ref(x, weights, biases, widths)

    assert out.shape == (B, filters * len(widths)), out.shape
    assert jnp.allclose(out, ref, atol=1e-4, rtol=1e-4), "Pallas output mismatch vs reference"

    print("KERNEL_OK")
</pallas_src>

<mosaic_0001>
module attributes {stable_mosaic.version = 11 : i64} {
  func.func @_cnn_text_fused_kernel(%arg0: i32, %arg1: memref<2x16x32xf32, #tpu.memory_space<vmem>>, %arg2: memref<5x32x128xf32, #tpu.memory_space<vmem>>, %arg3: memref<1x128xf32, #tpu.memory_space<vmem>>, %arg4: memref<16x128xf32, #tpu.memory_space<vmem>>, %arg5: memref<2x128xf32, #tpu.memory_space<vmem>>) attributes {dimension_semantics = [#tpu.dimension_semantics<parallel>], iteration_bounds = array<i64: 1>, scalar_prefetch = 0 : i64, scratch_operands = 0 : i64, tpu.core_type = #tpu.core_type<tc>, window_params = [{transform_indices = @transform_0, window_bounds = array<i64: 2, 16, 32>}, {pipeline_mode = #tpu.pipeline_mode<synchronous>, transform_indices = @transform_1, window_bounds = array<i64: 5, 32, 128>}, {pipeline_mode = #tpu.pipeline_mode<synchronous>, transform_indices = @transform_2, window_bounds = array<i64: 1, 128>}, {pipeline_mode = #tpu.pipeline_mode<synchronous>, transform_indices = @transform_3, window_bounds = array<i64: 16, 128>}, {transform_indices = @transform_4, window_bounds = array<i64: 2, 128>}]} {
    %c0 = arith.constant 0 : index
    %c0_0 = arith.constant 0 : index
    %c0_1 = arith.constant 0 : index
    %0 = vector.load %arg1[%c0, %c0_0, %c0_1] : memref<2x16x32xf32, #tpu.memory_space<vmem>>, vector<2x16x32xf32>
    %cst = arith.constant 0.000000e+00 : f32
    %1 = vector.broadcast %cst : f32 to vector<2x4x32xf32>
    %2 = tpu.concatenate %0, %1 in 1 : vector<2x16x32xf32>, vector<2x4x32xf32> -> vector<2x20x32xf32>
    %3 = vector.extract_strided_slice %2 {offsets = [0, 0, 0], sizes = [2, 16, 32], strides = [1, 1, 1]} : vector<2x20x32xf32> to vector<2x16x32xf32>
    %4 = vector.shape_cast %3 : vector<2x16x32xf32> to vector<32x32xf32>
    %c0_2 = arith.constant 0 : index
    %c0_3 = arith.constant 0 : index
    %c0_4 = arith.constant 0 : index
    %5 = vector.load %arg2[%c0_2, %c0_3, %c0_4] : memref<5x32x128xf32, #tpu.memory_space<vmem>>, vector<1x32x128xf32>
    %6 = vector.shape_cast %5 : vector<1x32x128xf32> to vector<32x128xf32>
    %cst_5 = arith.constant dense<0.000000e+00> : vector<32x128xf32>
    %7 = tpu.matmul %4, %6, %cst_5 {dimension_numbers = #tpu.dot_dimension_numbers<[1], [0], [0], [1], [0, 0, 1, 1], [], []>} : vector<32x32xf32>, vector<32x128xf32>, vector<32x128xf32> -> vector<32x128xf32>
    %8 = vector.extract_strided_slice %2 {offsets = [0, 1, 0], sizes = [2, 16, 32], strides = [1, 1, 1]} : vector<2x20x32xf32> to vector<2x16x32xf32>
    %9 = vector.shape_cast %8 : vector<2x16x32xf32> to vector<32x32xf32>
    %c1 = arith.constant 1 : index
    %c0_6 = arith.constant 0 : index
    %c0_7 = arith.constant 0 : index
    %10 = vector.load %arg2[%c1, %c0_6, %c0_7] : memref<5x32x128xf32, #tpu.memory_space<vmem>>, vector<1x32x128xf32>
    %11 = vector.shape_cast %10 : vector<1x32x128xf32> to vector<32x128xf32>
    %cst_8 = arith.constant dense<0.000000e+00> : vector<32x128xf32>
    %12 = tpu.matmul %9, %11, %cst_8 {dimension_numbers = #tpu.dot_dimension_numbers<[1], [0], [0], [1], [0, 0, 1, 1], [], []>} : vector<32x32xf32>, vector<32x128xf32>, vector<32x128xf32> -> vector<32x128xf32>
    %13 = arith.addf %7, %12 : vector<32x128xf32>
    %14 = vector.extract_strided_slice %2 {offsets = [0, 2, 0], sizes = [2, 16, 32], strides = [1, 1, 1]} : vector<2x20x32xf32> to vector<2x16x32xf32>
    %15 = vector.shape_cast %14 : vector<2x16x32xf32> to vector<32x32xf32>
    %c2 = arith.constant 2 : index
    %c0_9 = arith.constant 0 : index
    %c0_10 = arith.constant 0 : index
    %16 = vector.load %arg2[%c2, %c0_9, %c0_10] : memref<5x32x128xf32, #tpu.memory_space<vmem>>, vector<1x32x128xf32>
    %17 = vector.shape_cast %16 : vector<1x32x128xf32> to vector<32x128xf32>
    %cst_11 = arith.constant dense<0.000000e+00> : vector<32x128xf32>
    %18 = tpu.matmul %15, %17, %cst_11 {dimension_numbers = #tpu.dot_dimension_numbers<[1], [0], [0], [1], [0, 0, 1, 1], [], []>} : vector<32x32xf32>, vector<32x128xf32>, vector<32x128xf32> -> vector<32x128xf32>
    %19 = arith.addf %13, %18 : vector<32x128xf32>
    %20 = vector.extract_strided_slice %2 {offsets = [0, 3, 0], sizes = [2, 16, 32], strides = [1, 1, 1]} : vector<2x20x32xf32> to vector<2x16x32xf32>
    %21 = vector.shape_cast %20 : vector<2x16x32xf32> to vector<32x32xf32>
    %c3 = arith.constant 3 : index
    %c0_12 = arith.constant 0 : index
    %c0_13 = arith.constant 0 : index
    %22 = vector.load %arg2[%c3, %c0_12, %c0_13] : memref<5x32x128xf32, #tpu.memory_space<vmem>>, vector<1x32x128xf32>
    %23 = vector.shape_cast %22 : vector<1x32x128xf32> to vector<32x128xf32>
    %cst_14 = arith.constant dense<0.000000e+00> : vector<32x128xf32>
    %24 = tpu.matmul %21, %23, %cst_14 {dimension_numbers = #tpu.dot_dimension_numbers<[1], [0], [0], [1], [0, 0, 1, 1], [], []>} : vector<32x32xf32>, vector<32x128xf32>, vector<32x128xf32> -> vector<32x128xf32>
    %25 = arith.addf %19, %24 : vector<32x128xf32>
    %26 = vector.extract_strided_slice %2 {offsets = [0, 4, 0], sizes = [2, 16, 32], strides = [1, 1, 1]} : vector<2x20x32xf32> to vector<2x16x32xf32>
    %27 = vector.shape_cast %26 : vector<2x16x32xf32> to vector<32x32xf32>
    %c4 = arith.constant 4 : index
    %c0_15 = arith.constant 0 : index
    %c0_16 = arith.constant 0 : index
    %28 = vector.load %arg2[%c4, %c0_15, %c0_16] : memref<5x32x128xf32, #tpu.memory_space<vmem>>, vector<1x32x128xf32>
    %29 = vector.shape_cast %28 : vector<1x32x128xf32> to vector<32x128xf32>
    %cst_17 = arith.constant dense<0.000000e+00> : vector<32x128xf32>
    %30 = tpu.matmul %27, %29, %cst_17 {dimension_numbers = #tpu.dot_dimension_numbers<[1], [0], [0], [1], [0, 0, 1, 1], [], []>} : vector<32x32xf32>, vector<32x128xf32>, vector<32x128xf32> -> vector<32x128xf32>
    %31 = arith.addf %25, %30 : vector<32x128xf32>
    %32 = vector.shape_cast %31 : vector<32x128xf32> to vector<2x16x128xf32>
    %c0_18 = arith.constant 0 : index
    %c0_19 = arith.constant 0 : index
    %33 = vector.load %arg4[%c0_18, %c0_19] : memref<16x128xf32, #tpu.memory_space<vmem>>, vector<16x128xf32>
    %34 = vector.shape_cast %33 : vector<16x128xf32> to vector<1x16x128xf32>
    %35 = vector.broadcast %34 : vector<1x16x128xf32> to vector<2x16x128xf32>
    %36 = arith.addf %32, %35 : vector<2x16x128xf32>
    %cst_20 = arith.constant dense<0xFF800000> : vector<2x128xf32>
    %37 = vector.multi_reduction <maximumf>, %36, %cst_20 [1] : vector<2x16x128xf32> to vector<2x128xf32>
    %c0_21 = arith.constant 0 : index
    %c0_22 = arith.constant 0 : index
    %38 = vector.load %arg3[%c0_21, %c0_22] : memref<1x128xf32, #tpu.memory_space<vmem>>, vector<1x128xf32>
    %39 = vector.broadcast %38 : vector<1x128xf32> to vector<2x128xf32>
    %40 = arith.addf %37, %39 : vector<2x128xf32>
    %cst_23 = arith.constant 0.000000e+00 : f32
    %41 = vector.broadcast %cst_23 : f32 to vector<2x128xf32>
    %42 = arith.maximumf %40, %41 : vector<2x128xf32>
    %c0_24 = arith.constant 0 : index
    %c0_25 = arith.constant 0 : index
    %43 = vector.load %arg5[%c0_24, %c0_25] : memref<2x128xf32, #tpu.memory_space<vmem>>, vector<2x128xf32>
    tpu.vector_store %arg5[%c0_24, %c0_25], %42 {strides = array<i32>} : memref<2x128xf32, #tpu.memory_space<vmem>>, vector<2x128xf32>,
    return
  }
  func.func @transform_0(%arg0: i32) -> (i32, i32, i32) {
    %c0_i32 = arith.constant 0 : i32
    %c0_i32_0 = arith.constant 0 : i32
    %c0_i32_1 = arith.constant 0 : i32
    return %arg0, %c0_i32, %c0_i32_0 : i32, i32, i32
  }
  func.func @transform_1(%arg0: i32) -> (i32, i32, i32) {
    %c0_i32 = arith.constant 0 : i32
    %c0_i32_0 = arith.constant 0 : i32
    %c0_i32_1 = arith.constant 0 : i32
    %c0_i32_2 = arith.constant 0 : i32
    return %c0_i32, %c0_i32_0, %c0_i32_1 : i32, i32, i32
  }
  func.func @transform_2(%arg0: i32) -> (i32, i32) {
    %c0_i32 = arith.constant 0 : i32
    %c0_i32_0 = arith.constant 0 : i32
    %c0_i32_1 = arith.constant 0 : i32
    return %c0_i32, %c0_i32_0 : i32, i32
  }
  func.func @transform_3(%arg0: i32) -> (i32, i32) {
    %c0_i32 = arith.constant 0 : i32
    %c0_i32_0 = arith.constant 0 : i32
    %c0_i32_1 = arith.constant 0 : i32
    return %c0_i32, %c0_i32_0 : i32, i32
  }
  func.func @transform_4(%arg0: i32) -> (i32, i32) {
    %c0_i32 = arith.constant 0 : i32
    %c0_i32_0 = arith.constant 0 : i32
    return %arg0, %c0_i32 : i32, i32
  }
}

module attributes {stable_mosaic.version = 11 : i64} {
  func.func @_cnn_text_fused_kernel(%arg0: i32, %arg1: memref<2x16x32xf32, #tpu.memory_space<vmem>>, %arg2: memref<5x32x128xf32, #tpu.memory_space<vmem>>, %arg3: memref<1x128xf32, #tpu.memory_space<vmem>>, %arg4: memref<16x128xf32, #tpu.memory_space<vmem>>, %arg5: memref<2x128xf32, #tpu.memory_space<vmem>>) attributes {dimension_semantics = [#tpu.dimension_semantics<parallel>], iteration_bounds = array<i64: 1>, scalar_prefetch = 0 : i64, scratch_operands = 0 : i64, tpu.core_type = #tpu.core_type<tc>, window_params = [{transform_indices = @transform_0, window_bounds = array<i64: 2, 16, 32>}, {pipeline_mode = #tpu.pipeline_mode<synchronous>, transform_indices = @transform_1, window_bounds = array<i64: 5, 32, 128>}, {pipeline_mode = #tpu.pipeline_mode<synchronous>, transform_indices = @transform_2, window_bounds = array<i64: 1, 128>}, {pipeline_mode = #tpu.pipeline_mode<synchronous>, transform_indices = @transform_3, window_bounds = array<i64: 16, 128>}, {transform_indices = @transform_4, window_bounds = array<i64: 2, 128>}]} {
    %c0 = arith.constant 0 : index
    %c0_0 = arith.constant 0 : index
    %c0_1 = arith.constant 0 : index
    %0 = vector.load %arg1[%c0, %c0_0, %c0_1] : memref<2x16x32xf32, #tpu.memory_space<vmem>>, vector<2x16x32xf32>
    %cst = arith.constant 0.000000e+00 : f32
    %1 = vector.broadcast %cst : f32 to vector<2x4x32xf32>
    %2 = tpu.concatenate %0, %1 in 1 : vector<2x16x32xf32>, vector<2x4x32xf32> -> vector<2x20x32xf32>
    %3 = vector.extract_strided_slice %2 {offsets = [0, 0, 0], sizes = [2, 16, 32], strides = [1, 1, 1]} : vector<2x20x32xf32> to vector<2x16x32xf32>
    %4 = vector.shape_cast %3 : vector<2x16x32xf32> to vector<32x32xf32>
    %c0_2 = arith.constant 0 : index
    %c0_3 = arith.constant 0 : index
    %c0_4 = arith.constant 0 : index
    %5 = vector.load %arg2[%c0_2, %c0_3, %c0_4] : memref<5x32x128xf32, #tpu.memory_space<vmem>>, vector<1x32x128xf32>
    %6 = vector.shape_cast %5 : vector<1x32x128xf32> to vector<32x128xf32>
    %cst_5 = arith.constant dense<0.000000e+00> : vector<32x128xf32>
    %7 = tpu.matmul %4, %6, %cst_5 {dimension_numbers = #tpu.dot_dimension_numbers<[1], [0], [0], [1], [0, 0, 1, 1], [], []>} : vector<32x32xf32>, vector<32x128xf32>, vector<32x128xf32> -> vector<32x128xf32>
    %8 = vector.extract_strided_slice %2 {offsets = [0, 1, 0], sizes = [2, 16, 32], strides = [1, 1, 1]} : vector<2x20x32xf32> to vector<2x16x32xf32>
    %9 = vector.shape_cast %8 : vector<2x16x32xf32> to vector<32x32xf32>
    %c1 = arith.constant 1 : index
    %c0_6 = arith.constant 0 : index
    %c0_7 = arith.constant 0 : index
    %10 = vector.load %arg2[%c1, %c0_6, %c0_7] : memref<5x32x128xf32, #tpu.memory_space<vmem>>, vector<1x32x128xf32>
    %11 = vector.shape_cast %10 : vector<1x32x128xf32> to vector<32x128xf32>
    %cst_8 = arith.constant dense<0.000000e+00> : vector<32x128xf32>
    %12 = tpu.matmul %9, %11, %cst_8 {dimension_numbers = #tpu.dot_dimension_numbers<[1], [0], [0], [1], [0, 0, 1, 1], [], []>} : vector<32x32xf32>, vector<32x128xf32>, vector<32x128xf32> -> vector<32x128xf32>
    %13 = arith.addf %7, %12 : vector<32x128xf32>
    %14 = vector.extract_strided_slice %2 {offsets = [0, 2, 0], sizes = [2, 16, 32], strides = [1, 1, 1]} : vector<2x20x32xf32> to vector<2x16x32xf32>
    %15 = vector.shape_cast %14 : vector<2x16x32xf32> to vector<32x32xf32>
    %c2 = arith.constant 2 : index
    %c0_9 = arith.constant 0 : index
    %c0_10 = arith.constant 0 : index
    %16 = vector.load %arg2[%c2, %c0_9, %c0_10] : memref<5x32x128xf32, #tpu.memory_space<vmem>>, vector<1x32x128xf32>
    %17 = vector.shape_cast %16 : vector<1x32x128xf32> to vector<32x128xf32>
    %cst_11 = arith.constant dense<0.000000e+00> : vector<32x128xf32>
    %18 = tpu.matmul %15, %17, %cst_11 {dimension_numbers = #tpu.dot_dimension_numbers<[1], [0], [0], [1], [0, 0, 1, 1], [], []>} : vector<32x32xf32>, vector<32x128xf32>, vector<32x128xf32> -> vector<32x128xf32>
    %19 = arith.addf %13, %18 : vector<32x128xf32>
    %20 = vector.extract_strided_slice %2 {offsets = [0, 3, 0], sizes = [2, 16, 32], strides = [1, 1, 1]} : vector<2x20x32xf32> to vector<2x16x32xf32>
    %21 = vector.shape_cast %20 : vector<2x16x32xf32> to vector<32x32xf32>
    %c3 = arith.constant 3 : index
    %c0_12 = arith.constant 0 : index
    %c0_13 = arith.constant 0 : index
    %22 = vector.load %arg2[%c3, %c0_12, %c0_13] : memref<5x32x128xf32, #tpu.memory_space<vmem>>, vector<1x32x128xf32>
    %23 = vector.shape_cast %22 : vector<1x32x128xf32> to vector<32x128xf32>
    %cst_14 = arith.constant dense<0.000000e+00> : vector<32x128xf32>
    %24 = tpu.matmul %21, %23, %cst_14 {dimension_numbers = #tpu.dot_dimension_numbers<[1], [0], [0], [1], [0, 0, 1, 1], [], []>} : vector<32x32xf32>, vector<32x128xf32>, vector<32x128xf32> -> vector<32x128xf32>
    %25 = arith.addf %19, %24 : vector<32x128xf32>
    %26 = vector.extract_strided_slice %2 {offsets = [0, 4, 0], sizes = [2, 16, 32], strides = [1, 1, 1]} : vector<2x20x32xf32> to vector<2x16x32xf32>
    %27 = vector.shape_cast %26 : vector<2x16x32xf32> to vector<32x32xf32>
    %c4 = arith.constant 4 : index
    %c0_15 = arith.constant 0 : index
    %c0_16 = arith.constant 0 : index
    %28 = vector.load %arg2[%c4, %c0_15, %c0_16] : memref<5x32x128xf32, #tpu.memory_space<vmem>>, vector<1x32x128xf32>
    %29 = vector.shape_cast %28 : vector<1x32x128xf32> to vector<32x128xf32>
    %cst_17 = arith.constant dense<0.000000e+00> : vector<32x128xf32>
    %30 = tpu.matmul %27, %29, %cst_17 {dimension_numbers = #tpu.dot_dimension_numbers<[1], [0], [0], [1], [0, 0, 1, 1], [], []>} : vector<32x32xf32>, vector<32x128xf32>, vector<32x128xf32> -> vector<32x128xf32>
    %31 = arith.addf %25, %30 : vector<32x128xf32>
    %32 = vector.shape_cast %31 : vector<32x128xf32> to vector<2x16x128xf32>
    %c0_18 = arith.constant 0 : index
    %c0_19 = arith.constant 0 : index
    %33 = vector.load %arg4[%c0_18, %c0_19] : memref<16x128xf32, #tpu.memory_space<vmem>>, vector<16x128xf32>
    %34 = vector.shape_cast %33 : vector<16x128xf32> to vector<1x16x128xf32>
    %35 = vector.broadcast %34 : vector<1x16x128xf32> to vector<2x16x128xf32>
    %36 = arith.addf %32, %35 : vector<2x16x128xf32>
    %cst_20 = arith.constant dense<0xFF800000> : vector<2x128xf32>
    %37 = vector.multi_reduction <maximumf>, %36, %cst_20 [1] : vector<2x16x128xf32> to vector<2x128xf32>
    %c0_21 = arith.constant 0 : index
    %c0_22 = arith.constant 0 : index
    %38 = vector.load %arg3[%c0_21, %c0_22] : memref<1x128xf32, #tpu.memory_space<vmem>>, vector<1x128xf32>
    %39 = vector.broadcast %38 : vector<1x128xf32> to vector<2x128xf32>
    %40 = arith.addf %37, %39 : vector<2x128xf32>
    %cst_23 = arith.constant 0.000000e+00 : f32
    %41 = vector.broadcast %cst_23 : f32 to vector<2x128xf32>
    %42 = arith.maximumf %40, %41 : vector<2x128xf32>
    %c0_24 = arith.constant 0 : index
    %c0_25 = arith.constant 0 : index
    %43 = vector.load %arg5[%c0_24, %c0_25] : memref<2x128xf32, #tpu.memory_space<vmem>>, vector<2x128xf32>
    tpu.vector_store %arg5[%c0_24, %c0_25], %42 {strides = array<i32>} : memref<2x128xf32, #tpu.memory_space<vmem>>, vector<2x128xf32>,
    return
  }
  func.func @transform_0(%arg0: i32) -> (i32, i32, i32) {
    %c0_i32 = arith.constant 0 : i32
    %c0_i32_0 = arith.constant 0 : i32
    %c0_i32_1 = arith.constant 0 : i32
    return %arg0, %c0_i32, %c0_i32_0 : i32, i32, i32
  }
  func.func @transform_1(%arg0: i32) -> (i32, i32, i32) {
    %c0_i32 = arith.constant 0 : i32
    %c0_i32_0 = arith.constant 0 : i32
    %c0_i32_1 = arith.constant 0 : i32
    %c0_i32_2 = arith.constant 0 : i32
    return %c0_i32, %c0_i32_0, %c0_i32_1 : i32, i32, i32
  }
  func.func @transform_2(%arg0: i32) -> (i32, i32) {
    %c0_i32 = arith.constant 0 : i32
    %c0_i32_0 = arith.constant 0 : i32
    %c0_i32_1 = arith.constant 0 : i32
    return %c0_i32, %c0_i32_0 : i32, i32
  }
  func.func @transform_3(%arg0: i32) -> (i32, i32) {
    %c0_i32 = arith.constant 0 : i32
    %c0_i32_0 = arith.constant 0 : i32
    %c0_i32_1 = arith.constant 0 : i32
    return %c0_i32, %c0_i32_0 : i32, i32
  }
  func.func @transform_4(%arg0: i32) -> (i32, i32) {
    %c0_i32 = arith.constant 0 : i32
    %c0_i32_0 = arith.constant 0 : i32
    return %arg0, %c0_i32 : i32, i32
  }
}

</mosaic_0001>

<bundles_post_ra>
// kernel: tpu_custom_call.1
= control target key start
LH: loop header
LB: loop body
LE: loop exit
PB: predicated region body
PF: predicated region fallthrough
CT: control target
= control target key end

     0   :  { %9 = vsyncpa [#allocation3], 0  ;;  %s1007_s0 = inlined_call_operand.hbm [shape: f32[2,16,32], index: 0, kind: input, shape index: {}]   ;;  %s1008_s1 = inlined_call_operand.hbm [shape: f32[5,32,128], index: 1, kind: input, shape index: {}]   ;;  %s1009_s2 = inlined_call_operand.vmem [shape: f32[1,128], index: 2, kind: input, shape index: {}]   ;;  %s1010_s3 = inlined_call_operand.hbm [shape: f32[16,128], index: 3, kind: input, shape index: {}]   ;;  %s1011_s4 = inlined_call_operand.hbm [shape: f32[2,128], index: 4, kind: output, shape index: {}]  }
   0x1   :  { %10 = vsyncpa [#allocation6], 0 }
   0x2   :  { %11 = vsyncpa [#allocation4], 0  ;;  %s896_s15 = smov [#allocation5]   ;;  %s897_s17 = smov [#allocation2]  }
   0x3   :  { %s29_s16 = sshll.u32 %s896_s15, 4  ;;  %s17_s18 = sshll.u32 %s897_s17, 4  ;;  %s30_s16 = int_to_ptr.vmem [resolvable:$true] %s29_s16  ;;  %s18_s18 = int_to_ptr.vmem [resolvable:$true] %s17_s18 }
   0x4   :  { %s818_s19 = scalar_lea.vmem %s30_s16, 2560  ;;  %p823_p1 = scmp.lt.s32.totalorder %s30_s16, %s30_s16 }
   0x5   :  { %p819_p0 = scmp.ne.s32.totalorder %s30_s16, %s818_s19  ;;  %p824_p2 = scmp.lt.s32.totalorder %s818_s19, %s818_s19 }
   0x7   :  { %p825_p3 = por %p824_p2, %p823_p1 }
   0x9   :  { %p826_p4 = pnand %p825_p3, %p819_p0 }
   0xb   :  { %829 = shalt.err (!%p826_p4)
}
   0xc   :  { %s898_s20 = smov 128   ;;  %s899_s21 = smov 8  }
   0xd   :  { %35 = dma.hbm_to_vmem [thread:$0]  %s1008_s1, 2560, %s30_s16, [#allocation6], %s898_s20, %s898_s20, %s899_s21  }
   0xe   :  { %s838_s24 = scalar_lea.vmem %s18_s18, 512  ;;  %p843_p6 = scmp.lt.s32.totalorder %s18_s18, %s18_s18 }
   0xf   :  { %p839_p5 = scmp.ne.s32.totalorder %s18_s18, %s838_s24  ;;  %p844_p7 = scmp.lt.s32.totalorder %s838_s24, %s838_s24 }
  0x11   :  { %p845_p8 = por %p844_p7, %p843_p6 }
  0x13   :  { %p846_p9 = pnand %p845_p8, %p839_p5 }
  0x15   :  { %849 = shalt.err (!%p846_p9)
}
  0x16   :  { %23 = dma.hbm_to_vmem [thread:$0]  %s1007_s0, 512, %s18_s18, [#allocation3], %s898_s20, %s898_s20, %s899_s21  }
  0x17   :  { %s900_s27 = smov [#allocation7]  }
  0x18   :  { %s43_s28 = sshll.u32 %s900_s27, 4  ;;  %s44_s28 = int_to_ptr.vmem [resolvable:$true] %s43_s28 }
  0x19   :  { %s858_s29 = scalar_lea.vmem %s44_s28, 256  ;;  %p863_p11 = scmp.lt.s32.totalorder %s44_s28, %s44_s28 }
  0x1a   :  { %p859_p10 = scmp.ne.s32.totalorder %s44_s28, %s858_s29  ;;  %p864_p12 = scmp.lt.s32.totalorder %s858_s29, %s858_s29 }
  0x1c   :  { %p865_p13 = por %p864_p12, %p863_p11 }
  0x1e   :  { %p866_p0 = pnand %p865_p13, %p859_p10 }
  0x20   :  { %869 = shalt.err (!%p866_p0)
}
  0x21   :  { %49 = dma.hbm_to_vmem [thread:$0]  %s1010_s3, 256, %s44_s28, [#allocation6], %s898_s20, %s898_s20, %s899_s21  }
  0x22   :  { %890 = dma.done.wait [#allocation3], 512  }
  0x23   :  { %891 = vsyncadd [#allocation3], 4294966784 }
  0x24   :  { %892 = dma.done.wait [#allocation6], 2816  }
  0x25   :  { %893 = vsyncadd [#allocation6], 4294964480  ;;  %v86_v0 = vld [vmem:[#allocation5 + $0x38] sm:$0xff]  ;;  %v85_v2 = vld [vmem:[#allocation5 + $0x30] sm:$0xff]  ;;  %vm72_vm0 = vcmask 1046528   ;;  %v901_v9 = vmov 0.0  }
  0x26   :  { %v66_v1 = vld [vmem:[#allocation5 + $0x18] sm:$0xff]  ;;  %725 = vmatprep.subr.mxu0 %v86_v0  ;;  %v65_v3 = vld [vmem:[#allocation5 + $0x10] sm:$0xff]  ;;  %v84_v4 = vld [vmem:[#allocation5 + $0x28] sm:$0xff]  ;;  %v76_v10 = vrot.slane %v901_v9, 1  ;;  %vm87_vm1 = vcmask 261120   ;;  %vm274_vm2 = vcmask 1045504  }
  0x27   :  { %739 = vmatprep.subr.mxu1 %v66_v1  ;;  %726 = vmatpush3.msra.mxu0 %v86_v0  ;;  %v64_v5 = vld [vmem:[#allocation5 + $0x8] sm:$0xff]  ;;  %v937_v6 = vld [vmem:[#allocation2] sm:$0xff]  ;;  %v944_v14 = vld [vmem:[#allocation2 + $0x10] sm:$0xff]  ;;  %vm386_vm3 = vcmask 1044480   ;;  %v278_v32 = vrot.slane %v901_v9, 2  ;;  %v390_v33 = vrot.slane %v901_v9, 3 }
  0x28   :  { %740 = vmatpush3.msra.mxu1 %v66_v1  ;;  %727 = vmatprep.subr.mxu0 %v85_v2  ;;  %v939_v7 = vld [vmem:[#allocation2 + $0x8] sm:$0xff]  ;;  %v73_v8 = vrot.slane %v937_v6, 1  ;;  %v83_v11 = vld [vmem:[#allocation5 + $0x20] sm:$0xff]  ;;  %v946_v15 = vld [vmem:[#allocation2 + $0x18] sm:$0xff]  ;;  %v78_v18 = vrot.slane %v944_v14, 1  ;;  %v275_v26 = vrot.slane %v937_v6, 2 }
  0x29   :  { %741 = vmatprep.subr.mxu1 %v65_v3  ;;  %728 = vmatpush3.msra.mxu0 %v85_v2  ;;  %v63_v12 = vld [vmem:[#allocation5] sm:$0xff]  ;;  %v74_v13 = vrot.slane %v939_v7, 1  ;;  %v79_v19 = vrot.slane %v946_v15, 1  ;;  %v288_v20 = vld [vmem:[#allocation5 + $0x58] sm:$0xff]  ;;  %v287_v22 = vld [vmem:[#allocation5 + $0x50] sm:$0xff]  ;;  %v276_v27 = vrot.slane %v939_v7, 2 }
  0x2a   :  { %742 = vmatpush3.msra.mxu1 %v65_v3  ;;  %729 = vmatprep.subr.mxu0 %v84_v4  ;;  %v400_v21 = vld [vmem:[#allocation5 + $0x78] sm:$0xff]  ;;  %v399_v23 = vld [vmem:[#allocation5 + $0x70] sm:$0xff]  ;;  %v286_v28 = vld [vmem:[#allocation5 + $0x48] sm:$0xff]  ;;  %v387_v30 = vrot.slane %v937_v6, 3  ;;  %v388_v31 = vrot.slane %v939_v7, 3  ;;  %v280_v38 = vrot.slane %v944_v14, 2 }
  0x2b   :  { %743 = vmatprep.subr.mxu1 %v64_v5  ;;  %730 = vmatpush3.msra.mxu0 %v84_v4  ;;  %v75_v16 = vsel %vm72_vm0, %v73_v8, %v74_v13  ;;  %v77_v17 = vsel %vm72_vm0, %v74_v13, %v76_v10  ;;  %v80_v24 = vsel %vm72_vm0, %v78_v18, %v79_v19  ;;  %v398_v29 = vld [vmem:[#allocation5 + $0x68] sm:$0xff]  ;;  %v285_v34 = vld [vmem:[#allocation5 + $0x40] sm:$0xff]  ;;  %v392_v39 = vrot.slane %v944_v14, 3  ;;  %v512_v44 = vld [vmem:[#allocation5 + $0x98] sm:$0xff]  ;;  %s902_s5 = smov [#allocation8]  }
  0x2c   :  { %744 = vmatpush3.msra.mxu1 %v64_v5  ;;  %731 = vmatprep.subr.mxu0 %v83_v11  ;;  %v81_v25 = vsel %vm72_vm0, %v79_v19, %v76_v10  ;;  %v397_v35 = vld [vmem:[#allocation5 + $0x60] sm:$0xff]  ;;  %v277_v36 = vsel %vm274_vm2, %v275_v26, %v276_v27  ;;  %v389_v37 = vsel %vm386_vm3, %v387_v30, %v388_v31  ;;  %v281_v42 = vrot.slane %v946_v15, 2  ;;  %v511_v45 = vld [vmem:[#allocation5 + $0x90] sm:$0xff]  ;;  %v510_v50 = vld [vmem:[#allocation5 + $0x88] sm:$0xff]  ;;  %s654_s6 = sshll.u32 %s902_s5, 4  ;;  %s655_s6 = int_to_ptr.vmem [resolvable:$true] %s654_s6 }
  0x2d   :  { %745 = vmatprep.subr.mxu1 %v63_v12  ;;  %732 = vmatpush3.msra.mxu0 %v83_v11  ;;  %v279_v40 = vsel %vm274_vm2, %v276_v27, %v278_v32  ;;  %v391_v41 = vsel %vm386_vm3, %v388_v31, %v390_v33  ;;  %v393_v43 = vrot.slane %v946_v15, 3  ;;  %v499_v51 = vrot.slane %v937_v6, 4  ;;  %v509_v56 = vld [vmem:[#allocation5 + $0x80] sm:$0xff]  ;;  %s870_s7 = scalar_lea.vmem %s655_s6, 32  ;;  %p875_p2 = scmp.lt.s32.totalorder %s655_s6, %s655_s6 }
  0x2e   :  { %733 = vmatprep.mubr.msk.f32.mxu0 %vm87_vm1, %v75_v16  ;;  %746 = vmatpush3.msra.mxu1 %v63_v12  ;;  %v282_v46 = vsel %vm274_vm2, %v280_v38, %v281_v42  ;;  %v283_v48 = vsel %vm274_vm2, %v281_v42, %v278_v32  ;;  %v500_v52 = vrot.slane %v939_v7, 4  ;;  %v504_v53 = vrot.slane %v944_v14, 4  ;;  %v610_v31 = vld [vmem:[#allocation7] sm:$0xff]  ;;  %p871_p1 = scmp.ne.s32.totalorder %s655_s6, %s870_s7  ;;  %p876_p3 = scmp.lt.s32.totalorder %s870_s7, %s870_s7 }
  0x2f   :  { %747 = vmatprep.mubr.msk.f32.mxu1 %vm87_vm1, %v937_v6  ;;  %734 = vmatmul.mubr.msk.f32.vlgmr.msra.gmra.mxu0 %vm87_vm1, %v77_v17  ;;  %v394_v47 = vsel %vm386_vm3, %v392_v39, %v393_v43  ;;  %v395_v49 = vsel %vm386_vm3, %v393_v43, %v390_v33  ;;  %v505_v54 = vrot.slane %v946_v15, 4  ;;  %vm498_vm4 = vcmask 1043456  }
  0x30   :  { %748 = vmatmul.mubr.msk.f32.vlgmr.msra.gmra.mxu1 %vm87_vm1, %v939_v7  ;;  %753 = vmatprep.subr.mxu0 %v288_v20  ;;  %v502_v55 = vrot.slane %v901_v9, 4  ;;  %v501_v57 = vsel %vm498_vm4, %v499_v51, %v500_v52  ;;  %v684_v51 = vld [vmem:[%s1009_s2] ss:$0 sm:$0xff]  ;;  %vm644_vm5 = vcmask 1041409   ;;  %p877_p4 = por %p876_p3, %p875_p2 }
  0x31   :  { %767 = vmatprep.subr.mxu1 %v400_v21  ;;  %754 = vmatpush3.msra.mxu0 %v288_v20  ;;  %v506_v58 = vsel %vm498_vm4, %v504_v53, %v505_v54 }
  0x32   :  { %768 = vmatpush3.msra.mxu1 %v400_v21  ;;  %755 = vmatprep.subr.mxu0 %v287_v22  ;;  %v503_v59 = vsel %vm498_vm4, %v500_v52, %v502_v55  ;;  %v507_v60 = vsel %vm498_vm4, %v505_v54, %v502_v55  ;;  %p878_p5 = pnand %p877_p4, %p871_p1 }
  0x33   :  { %769 = vmatprep.subr.mxu1 %v399_v23  ;;  %736 = vmatprep.mubr.msk.f32.mxu0 %vm87_vm1, %v80_v24 }
  0x34   :  { %750 = vmatprep.mubr.msk.f32.mxu1 %vm87_vm1, %v944_v14  ;;  %756 = vmatpush3.msra.mxu0 %v287_v22 }
  0x35   :  { %770 = vmatpush3.msra.mxu1 %v399_v23  ;;  %737 = vmatmul.mubr.msk.f32.gmra.mxu0 %vm87_vm1, %v81_v25 }
  0x36   :  { %751 = vmatmul.mubr.msk.f32.gmra.mxu1 %vm87_vm1, %v946_v15  ;;  %757 = vmatprep.subr.mxu0 %v286_v28 }
  0x37   :  { %771 = vmatprep.subr.mxu1 %v398_v29  ;;  %758 = vmatpush3.msra.mxu0 %v286_v28 }
  0x38   :  { %772 = vmatpush3.msra.mxu1 %v398_v29  ;;  %759 = vmatprep.subr.mxu0 %v285_v34  ;;  %v611_v29 = vld [vmem:[#allocation7 + $0x8] sm:$0xff] }
  0x39   :  { %773 = vmatprep.subr.mxu1 %v397_v35  ;;  %760 = vmatpush3.msra.mxu0 %v285_v34 }
  0x3a   :  { %761 = vmatprep.mubr.msk.f32.mxu0 %vm87_vm1, %v277_v36  ;;  %774 = vmatpush3.msra.mxu1 %v397_v35 }
  0x3b   :  { %775 = vmatprep.mubr.msk.f32.mxu1 %vm87_vm1, %v389_v37  ;;  %762 = vmatmul.mubr.msk.f32.vlgmr.msra.gmra.mxu0 %vm87_vm1, %v279_v40 }
  0x3c   :  { %776 = vmatmul.mubr.msk.f32.vlgmr.msra.gmra.mxu1 %vm87_vm1, %v391_v41  ;;  %781 = vmatprep.subr.mxu0 %v512_v44 }
  0x3d   :  { %795 = vmatprep.subr.mxu1 %v512_v44  ;;  %782 = vmatpush3.msra.mxu0 %v512_v44 }
  0x3e   :  { %799 = vmatpush3.msra.mxu1 %v512_v44  ;;  %783 = vmatprep.subr.mxu0 %v511_v45 }
  0x3f   :  { %796 = vmatprep.subr.mxu1 %v511_v45  ;;  %764 = vmatprep.mubr.msk.f32.mxu0 %vm87_vm1, %v282_v46 }
  0x40   :  { %778 = vmatprep.mubr.msk.f32.mxu1 %vm87_vm1, %v394_v47  ;;  %784 = vmatpush3.msra.mxu0 %v511_v45 }
  0x41   :  { %800 = vmatpush3.msra.mxu1 %v511_v45  ;;  %765 = vmatmul.mubr.msk.f32.gmra.mxu0 %vm87_vm1, %v283_v48 }
  0x42   :  { %779 = vmatmul.mubr.msk.f32.gmra.mxu1 %vm87_vm1, %v395_v49  ;;  %785 = vmatprep.subr.mxu0 %v510_v50 }
  0x43   :  { %797 = vmatprep.subr.mxu1 %v510_v50  ;;  %786 = vmatpush3.msra.mxu0 %v510_v50 }
  0x44   :  { %801 = vmatpush3.msra.mxu1 %v510_v50  ;;  %787 = vmatprep.subr.mxu0 %v509_v56 }
  0x45   :  { %798 = vmatprep.subr.mxu1 %v509_v56  ;;  %788 = vmatpush3.msra.mxu0 %v509_v56 }
  0x46   :  { %802 = vmatpush3.msra.mxu1 %v509_v56  ;;  %789 = vmatprep.mubr.msk.f32.mxu0 %vm87_vm1, %v501_v57 }
  0x47   :  { %792 = vmatprep.mubr.msk.f32.mxu1 %vm87_vm1, %v506_v58  ;;  %790 = vmatmul.mubr.msk.f32.vlgmr.msra.gmra.mxu0 %vm87_vm1, %v503_v59 }
  0x48   :  { %793 = vmatmul.mubr.msk.f32.vlgmr.msra.gmra.mxu1 %vm87_vm1, %v507_v60 }
  0xef   :  { %v735_v61 = vpop.f32.mrf.mxu0 }
  0xf0   :  { %v749_v62 = vpop.f32.mrf.mxu1 }
  0xf1   :  { %v162_v63 = vpop.f32.mrf.mxu0  ;;  %v261_v9 = vadd.f32 %v749_v62, %v735_v61 }
  0xf2   :  { %v255_v0 = vpop.f32.mrf.mxu1 }
  0xf3   :  { %v256_v13 = vadd.f32 %v255_v0, %v162_v63 }
  0xf5   :  { %v738_v1 = vpop.f32.mrf.mxu0 }
  0xf6   :  { %v752_v2 = vpop.f32.mrf.mxu1 }
  0xf7   :  { %v172_v3 = vpop.f32.mrf.mxu0  ;;  %v271_v10 = vadd.f32 %v752_v2, %v738_v1 }
  0xf8   :  { %v265_v4 = vpop.f32.mrf.mxu1 }
  0xf9   :  { %v266_v14 = vadd.f32 %v265_v4, %v172_v3 }
  0xfb   :  { %v763_v5 = vpop.f32.mrf.mxu0 }
  0xfc   :  { %v777_v6 = vpop.f32.mrf.mxu1  ;;  %v383_v15 = vadd.f32 %v763_v5, %v261_v9 }
  0xfd   :  { %v363_v7 = vpop.f32.mrf.mxu0 }
  0xfe   :  { %v475_v8 = vpop.f32.mrf.mxu1  ;;  %v382_v19 = vadd.f32 %v363_v7, %v256_v13  ;;  %v495_v22 = vadd.f32 %v777_v6, %v383_v15 }
 0x100   :  { %v494_v26 = vadd.f32 %v475_v8, %v382_v19 }
 0x101   :  { %v766_v11 = vpop.f32.mrf.mxu0 }
 0x102   :  { %v780_v12 = vpop.f32.mrf.mxu1  ;;  %v385_v16 = vadd.f32 %v766_v11, %v271_v10 }
 0x103   :  { %v373_v17 = vpop.f32.mrf.mxu0 }
 0x104   :  { %v485_v18 = vpop.f32.mrf.mxu1  ;;  %v497_v20 = vadd.f32 %v780_v12, %v385_v16  ;;  %v384_v21 = vadd.f32 %v373_v17, %v266_v14 }
 0x106   :  { %v496_v23 = vadd.f32 %v485_v18, %v384_v21 }
 0x107   :  { %v791_v24 = vpop.f32.mrf.mxu0 }
 0x108   :  { %v794_v25 = vpop.f32.mrf.mxu1  ;;  %v607_v27 = vadd.f32 %v791_v24, %v495_v22 }
 0x109   :  { %v609_v28 = vadd.f32 %v794_v25, %v497_v20  ;;  %v587_v30 = vpop.f32.mrf.mxu0 }
 0x10a   :  { %v597_v32 = vpop.f32.mrf.mxu1  ;;  %v606_v33 = vadd.f32 %v587_v30, %v494_v26  ;;  %v613_v35 = vadd.f32 %v611_v29, %v607_v27 }
 0x10b   :  { %v608_v34 = vadd.f32 %v597_v32, %v496_v23  ;;  %v615_v36 = vadd.f32 %v611_v29, %v609_v28 }
 0x10c   :  { %v612_v37 = vadd.f32 %v610_v31, %v606_v33 }
 0x10d   :  { %v614_v38 = vadd.f32 %v610_v31, %v608_v34 }
 0x10e   :  { %v616_v39 = vmax.f32 %v612_v37, %v613_v35 }
 0x10f   :  { %v623_v40 = vmax.f32 %v614_v38, %v615_v36 }
 0x110   :  { %v617_v41 = vrot.slane %v616_v39, 4 }
 0x111   :  { %v624_v42 = vrot.slane %v623_v40, 4 }
 0x112   :  { %v618_v43 = vmax.f32 %v616_v39, %v617_v41 }
 0x113   :  { %v625_v44 = vmax.f32 %v623_v40, %v624_v42 }
 0x114   :  { %v619_v45 = vrot.slane %v618_v43, 2 }
 0x115   :  { %v626_v46 = vrot.slane %v625_v44, 2 }
 0x116   :  { %v620_v47 = vmax.f32 %v618_v43, %v619_v45 }
 0x117   :  { %v627_v48 = vmax.f32 %v625_v44, %v626_v46 }
 0x118   :  { %v621_v49 = vrot.slane %v620_v47, 1 }
 0x119   :  { %v628_v50 = vrot.slane %v627_v48, 1 }
 0x11a   :  { %v622_v52 = vmax.f32 %v620_v47, %v621_v49 }
 0x11b   :  { %v629_v53 = vmax.f32 %v627_v48, %v628_v50 }
 0x11c   :  { %v637_v54 = vadd.f32 %v684_v51, %v622_v52 }
 0x11d   :  { %v638_v55 = vadd.f32 %v684_v51, %v629_v53 }
 0x11e   :  { %v639_v57 = vmax.f32 %v637_v54, 0.0 }
 0x11f   :  { %v640_v56 = vmax.f32 %v638_v55, 0.0 }
 0x121   :  { %v643_v58 = vrot.slane %v640_v56, 7 }
 0x123   :  { %v645_v59 = vsel %vm644_vm5, %v643_v58, %v639_v57 }
 0x124   :  { %647 = vst [vmem:[#allocation8] sm:$0x3] %v645_v59 }
 0x125   :  { %881 = shalt.err (!%p878_p5)
}
 0x126   :  { %657 = dma.vmem_to_hbm [thread:$0]  %s655_s6, 32, %s1011_s4, [#allocation4]  }
 0x127   :  { %894 = dma.done.wait [#allocation4], 32  }
 0x128   :  { %895 = vsyncadd [#allocation4], 4294967264 }
 0x129   :  { %661 = vsyncpa [#allocation3], 1 }
 0x12a   :  { %662 = vsyncpa [#allocation6], 1 }
 0x12b   :  { %663 = vsyncpa [#allocation4], 1 }

// kernel: tpu_custom_call.1
= control target key start
LH: loop header
LB: loop body
LE: loop exit
PB: predicated region body
PF: predicated region fallthrough
CT: control target
= control target key end

     0   :  { %9 = vsyncpa [#allocation3], 0  ;;  %s1007_s0 = inlined_call_operand.hbm [shape: f32[2,16,32], index: 0, kind: input, shape index: {}]   ;;  %s1008_s1 = inlined_call_operand.hbm [shape: f32[5,32,128], index: 1, kind: input, shape index: {}]   ;;  %s1009_s2 = inlined_call_operand.vmem [shape: f32[1,128], index: 2, kind: input, shape index: {}]   ;;  %s1010_s3 = inlined_call_operand.hbm [shape: f32[16,128], index: 3, kind: input, shape index: {}]   ;;  %s1011_s4 = inlined_call_operand.hbm [shape: f32[2,128], index: 4, kind: output, shape index: {}]  }
   0x1   :  { %10 = vsyncpa [#allocation6], 0 }
   0x2   :  { %11 = vsyncpa [#allocation4], 0  ;;  %s896_s15 = smov [#allocation5]   ;;  %s897_s17 = smov [#allocation2]  }
   0x3   :  { %s29_s16 = sshll.u32 %s896_s15, 4  ;;  %s17_s18 = sshll.u32 %s897_s17, 4  ;;  %s30_s16 = int_to_ptr.vmem [resolvable:$true] %s29_s16  ;;  %s18_s18 = int_to_ptr.vmem [resolvable:$true] %s17_s18 }
   0x4   :  { %s818_s19 = scalar_lea.vmem %s30_s16, 2560  ;;  %p823_p1 = scmp.lt.s32.totalorder %s30_s16, %s30_s16 }
   0x5   :  { %p819_p0 = scmp.ne.s32.totalorder %s30_s16, %s818_s19  ;;  %p824_p2 = scmp.lt.s32.totalorder %s818_s19, %s818_s19 }
   0x7   :  { %p825_p3 = por %p824_p2, %p823_p1 }
   0x9   :  { %p826_p4 = pnand %p825_p3, %p819_p0 }
   0xb   :  { %829 = shalt.err (!%p826_p4)
}
   0xc   :  { %s898_s20 = smov 128   ;;  %s899_s21 = smov 8  }
   0xd   :  { %35 = dma.hbm_to_vmem [thread:$0]  %s1008_s1, 2560, %s30_s16, [#allocation6], %s898_s20, %s898_s20, %s899_s21  }
   0xe   :  { %s838_s24 = scalar_lea.vmem %s18_s18, 512  ;;  %p843_p6 = scmp.lt.s32.totalorder %s18_s18, %s18_s18 }
   0xf   :  { %p839_p5 = scmp.ne.s32.totalorder %s18_s18, %s838_s24  ;;  %p844_p7 = scmp.lt.s32.totalorder %s838_s24, %s838_s24 }
  0x11   :  { %p845_p8 = por %p844_p7, %p843_p6 }
  0x13   :  { %p846_p9 = pnand %p845_p8, %p839_p5 }
  0x15   :  { %849 = shalt.err (!%p846_p9)
}
  0x16   :  { %23 = dma.hbm_to_vmem [thread:$0]  %s1007_s0, 512, %s18_s18, [#allocation3], %s898_s20, %s898_s20, %s899_s21  }
  0x17   :  { %s900_s27 = smov [#allocation7]  }
  0x18   :  { %s43_s28 = sshll.u32 %s900_s27, 4  ;;  %s44_s28 = int_to_ptr.vmem [resolvable:$true] %s43_s28 }
  0x19   :  { %s858_s29 = scalar_lea.vmem %s44_s28, 256  ;;  %p863_p11 = scmp.lt.s32.totalorder %s44_s28, %s44_s28 }
  0x1a   :  { %p859_p10 = scmp.ne.s32.totalorder %s44_s28, %s858_s29  ;;  %p864_p12 = scmp.lt.s32.totalorder %s858_s29, %s858_s29 }
  0x1c   :  { %p865_p13 = por %p864_p12, %p863_p11 }
  0x1e   :  { %p866_p0 = pnand %p865_p13, %p859_p10 }
  0x20   :  { %869 = shalt.err (!%p866_p0)
}
  0x21   :  { %49 = dma.hbm_to_vmem [thread:$0]  %s1010_s3, 256, %s44_s28, [#allocation6], %s898_s20, %s898_s20, %s899_s21  }
  0x22   :  { %890 = dma.done.wait [#allocation3], 512  }
  0x23   :  { %891 = vsyncadd [#allocation3], 4294966784 }
  0x24   :  { %892 = dma.done.wait [#allocation6], 2816  }
  0x25   :  { %893 = vsyncadd [#allocation6], 4294964480  ;;  %v86_v0 = vld [vmem:[#allocation5 + $0x38] sm:$0xff]  ;;  %v85_v2 = vld [vmem:[#allocation5 + $0x30] sm:$0xff]  ;;  %vm72_vm0 = vcmask 1046528   ;;  %v901_v9 = vmov 0.0  }
  0x26   :  { %v66_v1 = vld [vmem:[#allocation5 + $0x18] sm:$0xff]  ;;  %725 = vmatprep.subr.mxu0 %v86_v0  ;;  %v65_v3 = vld [vmem:[#allocation5 + $0x10] sm:$0xff]  ;;  %v84_v4 = vld [vmem:[#allocation5 + $0x28] sm:$0xff]  ;;  %v76_v10 = vrot.slane %v901_v9, 1  ;;  %vm87_vm1 = vcmask 261120   ;;  %vm274_vm2 = vcmask 1045504  }
  0x27   :  { %739 = vmatprep.subr.mxu1 %v66_v1  ;;  %726 = vmatpush3.msra.mxu0 %v86_v0  ;;  %v64_v5 = vld [vmem:[#allocation5 + $0x8] sm:$0xff]  ;;  %v937_v6 = vld [vmem:[#allocation2] sm:$0xff]  ;;  %v944_v14 = vld [vmem:[#allocation2 + $0x10] sm:$0xff]  ;;  %vm386_vm3 = vcmask 1044480   ;;  %v278_v32 = vrot.slane %v901_v9, 2  ;;  %v390_v33 = vrot.slane %v901_v9, 3 }
  0x28   :  { %740 = vmatpush3.msra.mxu1 %v66_v1  ;;  %727 = vmatprep.subr.mxu0 %v85_v2  ;;  %v939_v7 = vld [vmem:[#allocation2 + $0x8] sm:$0xff]  ;;  %v73_v8 = vrot.slane %v937_v6, 1  ;;  %v83_v11 = vld [vmem:[#allocation5 + $0x20] sm:$0xff]  ;;  %v946_v15 = vld [vmem:[#allocation2 + $0x18] sm:$0xff]  ;;  %v78_v18 = vrot.slane %v944_v14, 1  ;;  %v275_v26 = vrot.slane %v937_v6, 2 }
  0x29   :  { %741 = vmatprep.subr.mxu1 %v65_v3  ;;  %728 = vmatpush3.msra.mxu0 %v85_v2  ;;  %v63_v12 = vld [vmem:[#allocation5] sm:$0xff]  ;;  %v74_v13 = vrot.slane %v939_v7, 1  ;;  %v79_v19 = vrot.slane %v946_v15, 1  ;;  %v288_v20 = vld [vmem:[#allocation5 + $0x58] sm:$0xff]  ;;  %v287_v22 = vld [vmem:[#allocation5 + $0x50] sm:$0xff]  ;;  %v276_v27 = vrot.slane %v939_v7, 2 }
  0x2a   :  { %742 = vmatpush3.msra.mxu1 %v65_v3  ;;  %729 = vmatprep.subr.mxu0 %v84_v4  ;;  %v400_v21 = vld [vmem:[#allocation5 + $0x78] sm:$0xff]  ;;  %v399_v23 = vld [vmem:[#allocation5 + $0x70] sm:$0xff]  ;;  %v286_v28 = vld [vmem:[#allocation5 + $0x48] sm:$0xff]  ;;  %v387_v30 = vrot.slane %v937_v6, 3  ;;  %v388_v31 = vrot.slane %v939_v7, 3  ;;  %v280_v38 = vrot.slane %v944_v14, 2 }
  0x2b   :  { %743 = vmatprep.subr.mxu1 %v64_v5  ;;  %730 = vmatpush3.msra.mxu0 %v84_v4  ;;  %v75_v16 = vsel %vm72_vm0, %v73_v8, %v74_v13  ;;  %v77_v17 = vsel %vm72_vm0, %v74_v13, %v76_v10  ;;  %v80_v24 = vsel %vm72_vm0, %v78_v18, %v79_v19  ;;  %v398_v29 = vld [vmem:[#allocation5 + $0x68] sm:$0xff]  ;;  %v285_v34 = vld [vmem:[#allocation5 + $0x40] sm:$0xff]  ;;  %v392_v39 = vrot.slane %v944_v14, 3  ;;  %v512_v44 = vld [vmem:[#allocation5 + $0x98] sm:$0xff]  ;;  %s902_s5 = smov [#allocation8]  }
  0x2c   :  { %744 = vmatpush3.msra.mxu1 %v64_v5  ;;  %731 = vmatprep.subr.mxu0 %v83_v11  ;;  %v81_v25 = vsel %vm72_vm0, %v79_v19, %v76_v10  ;;  %v397_v35 = vld [vmem:[#allocation5 + $0x60] sm:$0xff]  ;;  %v277_v36 = vsel %vm274_vm2, %v275_v26, %v276_v27  ;;  %v389_v37 = vsel %vm386_vm3, %v387_v30, %v388_v31  ;;  %v281_v42 = vrot.slane %v946_v15, 2  ;;  %v511_v45 = vld [vmem:[#allocation5 + $0x90] sm:$0xff]  ;;  %v510_v50 = vld [vmem:[#allocation5 + $0x88] sm:$0xff]  ;;  %s654_s6 = sshll.u32 %s902_s5, 4  ;;  %s655_s6 = int_to_ptr.vmem [resolvable:$true] %s654_s6 }
  0x2d   :  { %745 = vmatprep.subr.mxu1 %v63_v12  ;;  %732 = vmatpush3.msra.mxu0 %v83_v11  ;;  %v279_v40 = vsel %vm274_vm2, %v276_v27, %v278_v32  ;;  %v391_v41 = vsel %vm386_vm3, %v388_v31, %v390_v33  ;;  %v393_v43 = vrot.slane %v946_v15, 3  ;;  %v499_v51 = vrot.slane %v937_v6, 4  ;;  %v509_v56 = vld [vmem:[#allocation5 + $0x80] sm:$0xff]  ;;  %s870_s7 = scalar_lea.vmem %s655_s6, 32  ;;  %p875_p2 = scmp.lt.s32.totalorder %s655_s6, %s655_s6 }
  0x2e   :  { %733 = vmatprep.mubr.msk.f32.mxu0 %vm87_vm1, %v75_v16  ;;  %746 = vmatpush3.msra.mxu1 %v63_v12  ;;  %v282_v46 = vsel %vm274_vm2, %v280_v38, %v281_v42  ;;  %v283_v48 = vsel %vm274_vm2, %v281_v42, %v278_v32  ;;  %v500_v52 = vrot.slane %v939_v7, 4  ;;  %v504_v53 = vrot.slane %v944_v14, 4  ;;  %v610_v31 = vld [vmem:[#allocation7] sm:$0xff]  ;;  %p871_p1 = scmp.ne.s32.totalorder %s655_s6, %s870_s7  ;;  %p876_p3 = scmp.lt.s32.totalorder %s870_s7, %s870_s7 }
  0x2f   :  { %747 = vmatprep.mubr.msk.f32.mxu1 %vm87_vm1, %v937_v6  ;;  %734 = vmatmul.mubr.msk.f32.vlgmr.msra.gmra.mxu0 %vm87_vm1, %v77_v17  ;;  %v394_v47 = vsel %vm386_vm3, %v392_v39, %v393_v43  ;;  %v395_v49 = vsel %vm386_vm3, %v393_v43, %v390_v33  ;;  %v505_v54 = vrot.slane %v946_v15, 4  ;;  %vm498_vm4 = vcmask 1043456  }
  0x30   :  { %748 = vmatmul.mubr.msk.f32.vlgmr.msra.gmra.mxu1 %vm87_vm1, %v939_v7  ;;  %753 = vmatprep.subr.mxu0 %v288_v20  ;;  %v502_v55 = vrot.slane %v901_v9, 4  ;;  %v501_v57 = vsel %vm498_vm4, %v499_v51, %v500_v52  ;;  %v684_v51 = vld [vmem:[%s1009_s2] ss:$0 sm:$0xff]  ;;  %vm644_vm5 = vcmask 1041409   ;;  %p877_p4 = por %p876_p3, %p875_p2 }
  0x31   :  { %767 = vmatprep.subr.mxu1 %v400_v21  ;;  %754 = vmatpush3.msra.mxu0 %v288_v20  ;;  %v506_v58 = vsel %vm498_vm4, %v504_v53, %v505_v54 }
  0x32   :  { %768 = vmatpush3.msra.mxu1 %v400_v21  ;;  %755 = vmatprep.subr.mxu0 %v287_v22  ;;  %v503_v59 = vsel %vm498_vm4, %v500_v52, %v502_v55  ;;  %v507_v60 = vsel %vm498_vm4, %v505_v54, %v502_v55  ;;  %p878_p5 = pnand %p877_p4, %p871_p1 }
  0x33   :  { %769 = vmatprep.subr.mxu1 %v399_v23  ;;  %736 = vmatprep.mubr.msk.f32.mxu0 %vm87_vm1, %v80_v24 }
  0x34   :  { %750 = vmatprep.mubr.msk.f32.mxu1 %vm87_vm1, %v944_v14  ;;  %756 = vmatpush3.msra.mxu0 %v287_v22 }
  0x35   :  { %770 = vmatpush3.msra.mxu1 %v399_v23  ;;  %737 = vmatmul.mubr.msk.f32.gmra.mxu0 %vm87_vm1, %v81_v25 }
  0x36   :  { %751 = vmatmul.mubr.msk.f32.gmra.mxu1 %vm87_vm1, %v946_v15  ;;  %757 = vmatprep.subr.mxu0 %v286_v28 }
  0x37   :  { %771 = vmatprep.subr.mxu1 %v398_v29  ;;  %758 = vmatpush3.msra.mxu0 %v286_v28 }
  0x38   :  { %772 = vmatpush3.msra.mxu1 %v398_v29  ;;  %759 = vmatprep.subr.mxu0 %v285_v34  ;;  %v611_v29 = vld [vmem:[#allocation7 + $0x8] sm:$0xff] }
  0x39   :  { %773 = vmatprep.subr.mxu1 %v397_v35  ;;  %760 = vmatpush3.msra.mxu0 %v285_v34 }
  0x3a   :  { %761 = vmatprep.mubr.msk.f32.mxu0 %vm87_vm1, %v277_v36  ;;  %774 = vmatpush3.msra.mxu1 %v397_v35 }
  0x3b   :  { %775 = vmatprep.mubr.msk.f32.mxu1 %vm87_vm1, %v389_v37  ;;  %762 = vmatmul.mubr.msk.f32.vlgmr.msra.gmra.mxu0 %vm87_vm1, %v279_v40 }
  0x3c   :  { %776 = vmatmul.mubr.msk.f32.vlgmr.msra.gmra.mxu1 %vm87_vm1, %v391_v41  ;;  %781 = vmatprep.subr.mxu0 %v512_v44 }
  0x3d   :  { %795 = vmatprep.subr.mxu1 %v512_v44  ;;  %782 = vmatpush3.msra.mxu0 %v512_v44 }
  0x3e   :  { %799 = vmatpush3.msra.mxu1 %v512_v44  ;;  %783 = vmatprep.subr.mxu0 %v511_v45 }
  0x3f   :  { %796 = vmatprep.subr.mxu1 %v511_v45  ;;  %764 = vmatprep.mubr.msk.f32.mxu0 %vm87_vm1, %v282_v46 }
  0x40   :  { %778 = vmatprep.mubr.msk.f32.mxu1 %vm87_vm1, %v394_v47  ;;  %784 = vmatpush3.msra.mxu0 %v511_v45 }
  0x41   :  { %800 = vmatpush3.msra.mxu1 %v511_v45  ;;  %765 = vmatmul.mubr.msk.f32.gmra.mxu0 %vm87_vm1, %v283_v48 }
  0x42   :  { %779 = vmatmul.mubr.msk.f32.gmra.mxu1 %vm87_vm1, %v395_v49  ;;  %785 = vmatprep.subr.mxu0 %v510_v50 }
  0x43   :  { %797 = vmatprep.subr.mxu1 %v510_v50  ;;  %786 = vmatpush3.msra.mxu0 %v510_v50 }
  0x44   :  { %801 = vmatpush3.msra.mxu1 %v510_v50  ;;  %787 = vmatprep.subr.mxu0 %v509_v56 }
  0x45   :  { %798 = vmatprep.subr.mxu1 %v509_v56  ;;  %788 = vmatpush3.msra.mxu0 %v509_v56 }
  0x46   :  { %802 = vmatpush3.msra.mxu1 %v509_v56  ;;  %789 = vmatprep.mubr.msk.f32.mxu0 %vm87_vm1, %v501_v57 }
  0x47   :  { %792 = vmatprep.mubr.msk.f32.mxu1 %vm87_vm1, %v506_v58  ;;  %790 = vmatmul.mubr.msk.f32.vlgmr.msra.gmra.mxu0 %vm87_vm1, %v503_v59 }
  0x48   :  { %793 = vmatmul.mubr.msk.f32.vlgmr.msra.gmra.mxu1 %vm87_vm1, %v507_v60 }
  0xef   :  { %v735_v61 = vpop.f32.mrf.mxu0 }
  0xf0   :  { %v749_v62 = vpop.f32.mrf.mxu1 }
  0xf1   :  { %v162_v63 = vpop.f32.mrf.mxu0  ;;  %v261_v9 = vadd.f32 %v749_v62, %v735_v61 }
  0xf2   :  { %v255_v0 = vpop.f32.mrf.mxu1 }
  0xf3   :  { %v256_v13 = vadd.f32 %v255_v0, %v162_v63 }
  0xf5   :  { %v738_v1 = vpop.f32.mrf.mxu0 }
  0xf6   :  { %v752_v2 = vpop.f32.mrf.mxu1 }
  0xf7   :  { %v172_v3 = vpop.f32.mrf.mxu0  ;;  %v271_v10 = vadd.f32 %v752_v2, %v738_v1 }
  0xf8   :  { %v265_v4 = vpop.f32.mrf.mxu1 }
  0xf9   :  { %v266_v14 = vadd.f32 %v265_v4, %v172_v3 }
  0xfb   :  { %v763_v5 = vpop.f32.mrf.mxu0 }
  0xfc   :  { %v777_v6 = vpop.f32.mrf.mxu1  ;;  %v383_v15 = vadd.f32 %v763_v5, %v261_v9 }
  0xfd   :  { %v363_v7 = vpop.f32.mrf.mxu0 }
  0xfe   :  { %v475_v8 = vpop.f32.mrf.mxu1  ;;  %v382_v19 = vadd.f32 %v363_v7, %v256_v13  ;;  %v495_v22 = vadd.f32 %v777_v6, %v383_v15 }
 0x100   :  { %v494_v26 = vadd.f32 %v475_v8, %v382_v19 }
 0x101   :  { %v766_v11 = vpop.f32.mrf.mxu0 }
 0x102   :  { %v780_v12 = vpop.f32.mrf.mxu1  ;;  %v385_v16 = vadd.f32 %v766_v11, %v271_v10 }
 0x103   :  { %v373_v17 = vpop.f32.mrf.mxu0 }
 0x104   :  { %v485_v18 = vpop.f32.mrf.mxu1  ;;  %v497_v20 = vadd.f32 %v780_v12, %v385_v16  ;;  %v384_v21 = vadd.f32 %v373_v17, %v266_v14 }
 0x106   :  { %v496_v23 = vadd.f32 %v485_v18, %v384_v21 }
 0x107   :  { %v791_v24 = vpop.f32.mrf.mxu0 }
 0x108   :  { %v794_v25 = vpop.f32.mrf.mxu1  ;;  %v607_v27 = vadd.f32 %v791_v24, %v495_v22 }
 0x109   :  { %v609_v28 = vadd.f32 %v794_v25, %v497_v20  ;;  %v587_v30 = vpop.f32.mrf.mxu0 }
 0x10a   :  { %v597_v32 = vpop.f32.mrf.mxu1  ;;  %v606_v33 = vadd.f32 %v587_v30, %v494_v26  ;;  %v613_v35 = vadd.f32 %v611_v29, %v607_v27 }
 0x10b   :  { %v608_v34 = vadd.f32 %v597_v32, %v496_v23  ;;  %v615_v36 = vadd.f32 %v611_v29, %v609_v28 }
 0x10c   :  { %v612_v37 = vadd.f32 %v610_v31, %v606_v33 }
 0x10d   :  { %v614_v38 = vadd.f32 %v610_v31, %v608_v34 }
 0x10e   :  { %v616_v39 = vmax.f32 %v612_v37, %v613_v35 }
 0x10f   :  { %v623_v40 = vmax.f32 %v614_v38, %v615_v36 }
 0x110   :  { %v617_v41 = vrot.slane %v616_v39, 4 }
 0x111   :  { %v624_v42 = vrot.slane %v623_v40, 4 }
 0x112   :  { %v618_v43 = vmax.f32 %v616_v39, %v617_v41 }
 0x113   :  { %v625_v44 = vmax.f32 %v623_v40, %v624_v42 }
 0x114   :  { %v619_v45 = vrot.slane %v618_v43, 2 }
 0x115   :  { %v626_v46 = vrot.slane %v625_v44, 2 }
 0x116   :  { %v620_v47 = vmax.f32 %v618_v43, %v619_v45 }
 0x117   :  { %v627_v48 = vmax.f32 %v625_v44, %v626_v46 }
 0x118   :  { %v621_v49 = vrot.slane %v620_v47, 1 }
 0x119   :  { %v628_v50 = vrot.slane %v627_v48, 1 }
 0x11a   :  { %v622_v52 = vmax.f32 %v620_v47, %v621_v49 }
 0x11b   :  { %v629_v53 = vmax.f32 %v627_v48, %v628_v50 }
 0x11c   :  { %v637_v54 = vadd.f32 %v684_v51, %v622_v52 }
 0x11d   :  { %v638_v55 = vadd.f32 %v684_v51, %v629_v53 }
 0x11e   :  { %v639_v57 = vmax.f32 %v637_v54, 0.0 }
 0x11f   :  { %v640_v56 = vmax.f32 %v638_v55, 0.0 }
 0x121   :  { %v643_v58 = vrot.slane %v640_v56, 7 }
 0x123   :  { %v645_v59 = vsel %vm644_vm5, %v643_v58, %v639_v57 }
 0x124   :  { %647 = vst [vmem:[#allocation8] sm:$0x3] %v645_v59 }
 0x125   :  { %881 = shalt.err (!%p878_p5)
}
 0x126   :  { %657 = dma.vmem_to_hbm [thread:$0]  %s655_s6, 32, %s1011_s4, [#allocation4]  }
 0x127   :  { %894 = dma.done.wait [#allocation4], 32  }
 0x128   :  { %895 = vsyncadd [#allocation4], 4294967264 }
 0x129   :  { %661 = vsyncpa [#allocation3], 1 }
 0x12a   :  { %662 = vsyncpa [#allocation6], 1 }
 0x12b   :  { %663 = vsyncpa [#allocation4], 1 }

</bundles_post_ra>
